<compile_context>
chip_gen: v6e
topology: v6e:2x2x1
jax: 0.10.0
libtpu: 0.0.40
codegen_flags: <defaults>
</compile_context>

<pallas_src>
import numpy as np
import jax
import jax.numpy as jnp
from jax.experimental import pallas as pl
from jax.experimental.pallas import tpu as pltpu


# -----------------------------------------------------------------------------
# Kernel: one (sample, lane-block) step == one MXU matmul, nothing else.
# -----------------------------------------------------------------------------
def _tailnet_matmul_kernel(d_ref, p_ref, o_ref):
    # d_ref: (1, C_out, Kpad)  per-sample dictionary (tap-major K, zero-padded)
    # p_ref: (1, Kpad, T)      lane-dense im2col patch block (T % 128 == 0)
    # o_ref: (1, C_out, T)     lane-dense flattened-spatial output block
    o_ref[0] = jnp.dot(d_ref[0], p_ref[0],
                       preferred_element_type=jnp.float32).astype(o_ref.dtype)


# -----------------------------------------------------------------------------
# Helpers
# -----------------------------------------------------------------------------
def _round_up(a, b):
    return -(-a // b) * b


def _vmem_budget_bytes():
    """Generation-aware VMEM budget (3/4 of physical; conservative fallback)."""
    try:
        cap = int(pltpu.get_tpu_info().vmem_capacity_bytes)
    except Exception:
        cap = 64 * 1024 * 1024          # v7x physical per-TC VMEM (smallest)
    return (3 * cap) // 4


def _pick_lane_tile(l, kpad, cout, in_isz, out_isz, budget, lane_tile_cap):
    """Largest multiple-of-128 lane tile fitting the (double-buffered) budget."""
    per_lane = 2 * (kpad * in_isz + cout * out_isz)      # patches + out blocks
    fixed = 2 * cout * kpad * in_isz + (2 << 20)         # resident d + slack
    avail = max(budget - fixed, per_lane * 128)
    tile = min(lane_tile_cap,
               (avail // per_lane) // 128 * 128,
               _round_up(l, 128))
    return max(128, int(tile))


# -----------------------------------------------------------------------------
# Wrapper: circular pad + wrapper-side im2col + per-sample matmul kernel.
# -----------------------------------------------------------------------------
def tailnet_forward(x, d, *, matmul_dtype=jnp.bfloat16, out_dtype=None,
                    lane_tile_cap=4096):
    """x: (N, C_in, H, W); d: (N, C_out, C_in, ds, ds) -> (N, C_out, Ho, Wo)."""
    n, cin, h, w = x.shape
    nd, cout, cin_d, ds, ds2 = d.shape
    assert nd == n and cin_d == cin and ds2 == ds
    out_dtype = x.dtype if out_dtype is None else out_dtype

    p = (ds - 1) // 2
    # Circular padding == torch F.pad(..., mode='circular').
    xp = jnp.pad(x, ((0, 0), (0, 0), (p, p), (p, p)),
                 mode='wrap').astype(matmul_dtype)
    hp, wp = h + 2 * p, w + 2 * p
    ho, wo = hp - ds + 1, wp - ds + 1               # = H, W for odd ds

    # ---- Wrapper-side im2col (tap-major K: index = (dy*ds+dx)*C_in + ci) ----
    k = ds * ds * cin
    l = ho * wo
    taps = [xp[:, :, dy:dy + ho, dx:dx + wo]        # each (N, C_in, Ho, Wo)
            for dy in range(ds) for dx in range(ds)]
    patches = jnp.concatenate(taps, axis=1).reshape(n, k, l)

    # Matching dictionary layout: (N, C_out, ds, ds, C_in) -> (N, C_out, K).
    d_mat = jnp.transpose(d, (0, 1, 3, 4, 2)).reshape(n, cout, k)
    d_mat = d_mat.astype(matmul_dtype)

    # ---- Padding: K to full MXU depth when cheap, lanes to the tile size ----
    kpad = _round_up(k, 8)
    k128 = _round_up(k, 128)
    if k128 <= 2 * kpad:                            # modest overhead -> pad
        kpad = k128

    in_isz = jnp.dtype(matmul_dtype).itemsize
    out_isz = jnp.dtype(out_dtype).itemsize
    budget = _vmem_budget_bytes()
    tile = _pick_lane_tile(l, kpad, cout, in_isz, out_isz, budget,
                           lane_tile_cap)
    lpad = _round_up(l, tile)

    patches = jnp.pad(patches, ((0, 0), (0, kpad - k), (0, lpad - l)))
    d_mat = jnp.pad(d_mat, ((0, 0), (0, 0), (0, kpad - k)))

    need = 2 * (cout * kpad * in_isz + kpad * tile * in_isz
                + cout * tile * out_isz) + (4 << 20)
    vmem_limit = int(min(budget, max(32 * 1024 * 1024, need)))

    out_flat = pl.pallas_call(
        _tailnet_matmul_kernel,
        out_shape=jax.ShapeDtypeStruct((n, cout, lpad), out_dtype),
        grid=(n, lpad // tile),
        in_specs=[
            # Constant block index over the lane axis -> d stays VMEM-resident.
            pl.BlockSpec((1, cout, kpad), lambda i, j: (i, 0, 0)),
            pl.BlockSpec((1, kpad, tile), lambda i, j: (i, 0, j)),
        ],
        out_specs=pl.BlockSpec((1, cout, tile), lambda i, j: (i, 0, j)),
        compiler_params=pltpu.CompilerParams(
            dimension_semantics=("parallel", "parallel"),
            vmem_limit_bytes=vmem_limit),
        cost_estimate=pl.CostEstimate(
            flops=2 * n * cout * kpad * lpad,
            transcendentals=0,
            bytes_accessed=(n * kpad * lpad * in_isz
                            + n * cout * kpad * in_isz
                            + n * cout * lpad * out_isz)),
    )(d_mat, patches)

    return out_flat[:, :, :l].reshape(n, cout, ho, wo)


# -----------------------------------------------------------------------------
if __name__ == "__main__":
    key = jax.random.PRNGKey(0)
    kx, kd = jax.random.split(key)

    N, C_in, C_out, H, W, ds = 2, 8, 3, 16, 16, 5
    x = jax.random.normal(kx, (N, C_in, H, W), jnp.float32)
    d = jax.random.normal(kd, (N, C_out, C_in, ds, ds), jnp.float32) * 0.1

    fwd = jax.jit(tailnet_forward)
    y = fwd(x, d)
    jax.block_until_ready(y)

    assert y.shape == (N, C_out, H, W)
    assert bool(jnp.all(jnp.isfinite(y)))

    # float64 numpy reference: circular pad + per-sample cross-correlation
    # (PyTorch F.conv2d semantics, sample_wise=True).
    p = (ds - 1) // 2
    xn = np.asarray(x, np.float64)
    dn = np.asarray(d, np.float64)
    xpad = np.pad(xn, ((0, 0), (0, 0), (p, p), (p, p)), mode='wrap')
    ref = np.zeros((N, C_out, H, W), np.float64)
    for dy in range(ds):
        for dx in range(ds):
            ref += np.einsum('nchw,noc->nohw',
                             xpad[:, :, dy:dy + H, dx:dx + W],
                             dn[:, :, :, dy, dx])
    err = float(np.max(np.abs(np.asarray(y, np.float64) - ref)))
    assert err < 5e-2, f"max abs err vs reference: {err}"

    print("KERNEL_OK")
</pallas_src>

<mosaic_0001>
module attributes {stable_mosaic.version = 11 : i64} {
  func.func @_tailnet_matmul_kernel(%arg0: i32, %arg1: i32, %arg2: memref<1x3x256xbf16, #tpu.memory_space<vmem>>, %arg3: memref<1x256x256xbf16, #tpu.memory_space<vmem>>, %arg4: memref<1x3x256xf32, #tpu.memory_space<vmem>>) attributes {dimension_semantics = [#tpu.dimension_semantics<parallel>, #tpu.dimension_semantics<parallel>], iteration_bounds = array<i64: 2, 1>, scalar_prefetch = 0 : i64, scratch_operands = 0 : i64, tpu.core_type = #tpu.core_type<tc>, window_params = [{transform_indices = @transform_0, window_bounds = array<i64: 1, 3, 256>}, {transform_indices = @transform_1, window_bounds = array<i64: 1, 256, 256>}, {transform_indices = @transform_2, window_bounds = array<i64: 1, 3, 256>}]} {
    %c0 = arith.constant 0 : index
    %c0_0 = arith.constant 0 : index
    %c0_1 = arith.constant 0 : index
    %0 = vector.load %arg2[%c0, %c0_0, %c0_1] : memref<1x3x256xbf16, #tpu.memory_space<vmem>>, vector<1x3x256xbf16>
    %1 = vector.shape_cast %0 : vector<1x3x256xbf16> to vector<3x256xbf16>
    %c0_2 = arith.constant 0 : index
    %c0_3 = arith.constant 0 : index
    %c0_4 = arith.constant 0 : index
    %2 = vector.load %arg3[%c0_2, %c0_3, %c0_4] : memref<1x256x256xbf16, #tpu.memory_space<vmem>>, vector<1x256x256xbf16>
    %3 = vector.shape_cast %2 : vector<1x256x256xbf16> to vector<256x256xbf16>
    %cst = arith.constant dense<0.000000e+00> : vector<3x256xf32>
    %4 = tpu.matmul %1, %3, %cst {dimension_numbers = #tpu.dot_dimension_numbers<[1], [0], [0], [1], [0, 0, 1, 1], [], []>} : vector<3x256xbf16>, vector<256x256xbf16>, vector<3x256xf32> -> vector<3x256xf32>
    %c0_5 = arith.constant 0 : index
    %c0_6 = arith.constant 0 : index
    %c0_7 = arith.constant 0 : index
    %5 = vector.load %arg4[%c0_5, %c0_6, %c0_7] : memref<1x3x256xf32, #tpu.memory_space<vmem>>, vector<1x3x256xf32>
    %6 = vector.shape_cast %5 : vector<1x3x256xf32> to vector<3x256xf32>
    %7 = vector.shape_cast %4 : vector<3x256xf32> to vector<1x3x256xf32>
    tpu.vector_store %arg4[%c0_5, %c0_6, %c0_7], %7 {strides = array<i32>} : memref<1x3x256xf32, #tpu.memory_space<vmem>>, vector<1x3x256xf32>,
    return
  }
  func.func @transform_0(%arg0: i32, %arg1: i32) -> (i32, i32, i32) {
    %c0_i32 = arith.constant 0 : i32
    %c0_i32_0 = arith.constant 0 : i32
    %c0_i32_1 = arith.constant 0 : i32
    return %arg0, %c0_i32, %c0_i32_0 : i32, i32, i32
  }
  func.func @transform_1(%arg0: i32, %arg1: i32) -> (i32, i32, i32) {
    %c0_i32 = arith.constant 0 : i32
    %c0_i32_0 = arith.constant 0 : i32
    return %arg0, %c0_i32, %arg1 : i32, i32, i32
  }
  func.func @transform_2(%arg0: i32, %arg1: i32) -> (i32, i32, i32) {
    %c0_i32 = arith.constant 0 : i32
    %c0_i32_0 = arith.constant 0 : i32
    return %arg0, %c0_i32, %arg1 : i32, i32, i32
  }
}

</mosaic_0001>

<bundles_post_ra>
// kernel: tailnet_forward.1
= control target key start
LH: loop header
LB: loop body
LE: loop exit
PB: predicated region body
PF: predicated region fallthrough
CT: control target
= control target key end

     0   :  { %s712_s9 = smov 0   ;;  %s714_s10 = smov 0   ;;  %s787_s0 = inlined_call_operand.vmem [shape: bf16[2,3,256], index: 0, kind: input, shape index: {}]   ;;  %s788_s1 = inlined_call_operand.vmem [shape: bf16[2,256,256], index: 1, kind: input, shape index: {}]   ;;  %s789_s2 = inlined_call_operand.vmem [shape: f32[2,3,256], index: 2, kind: output, shape index: {}]  }
   0x1   :  { %s716_s11 = smov 0  }
   0x2 LB: > { %s24_s12 = sadd.s32 1, %s691_s10  ;;  %p556_p0 = scmp.ge.s32.totalorder %s695_s11, 1  ;;  %s695_s11 = sphi %s716_s11, %s12_s11   ;;  %s691_s10 = sphi %s714_s10, %s791_s10   ;;  %s687_s9 = sphi %s712_s9, %s790_s9  }
   0x3   : > { %p26_p1 = scmp.ge.s32.totalorder %s24_s12, 2  ;;  %p143_p2 = scmp.lt.s32.totalorder %s695_s11, 3 }
   0x5   : > { %s793_s12 = smov (%p26_p1, %s24_s12), 0  ;;  %p144_p3 = pnand %p556_p0, %p143_p2 }
   0x6   : > { %p178_p4 = scmp.lt.s32.totalorder (!%p144_p3), %s687_s9, 1 }
   0x7   : > { %147 = sbr.rel (%p144_p3) target bundleno = 279 (0x117), region = 28 }
   0xc   : > { %s795_s9 = smov (!%p178_p4, %s687_s9), 1 }
   0xd   : > { %s599_s13 = sshll.u32 %s795_s9, 8  ;;  %s598_s17 = sshll.u32 %s795_s9, 2 }
   0xe   : > { %s736_s16 = scalar_lea.vmem %s788_s1, %s599_s13  ;;  %s182_s20 = scalar_lea.vmem %s787_s0, %s598_s17 }
   0xf   : > { %v625_v0 = vld [vmem:[%s736_s16 + $0x74] ss:$8 sps:$4 sm:$0xff]   ;;  %v627_v1 = vld [vmem:[%s736_s16 + $0x70] ss:$8 sps:$4 sm:$0xff]   ;;  %v628_v2 = vld [vmem:[%s736_s16 + $0x64] ss:$8 sps:$4 sm:$0xff]  }
  0x10   : > { %407 = vmatprep.subr.bf16.mxu0 %v625_v0  ;;  %v630_v3 = vld [vmem:[%s736_s16 + $0x60] ss:$8 sps:$4 sm:$0xff]   ;;  %v631_v4 = vld [vmem:[%s736_s16 + $0x54] ss:$8 sps:$4 sm:$0xff]   ;;  %v633_v5 = vld [vmem:[%s736_s16 + $0x50] ss:$8 sps:$4 sm:$0xff]  }
  0x11   : > { %408 = vmatpush1.bf16.msra.mxu0 %v627_v1  ;;  %v634_v6 = vld [vmem:[%s736_s16 + $0x44] ss:$8 sps:$4 sm:$0xff]   ;;  %v636_v7 = vld [vmem:[%s736_s16 + $0x40] ss:$8 sps:$4 sm:$0xff]   ;;  %v637_v8 = vld [vmem:[%s736_s16 + $0x34] ss:$8 sps:$4 sm:$0xff]  }
  0x12   : > { %409 = vmatprep.subr.bf16.mxu0 %v628_v2  ;;  %v639_v9 = vld [vmem:[%s736_s16 + $0x30] ss:$8 sps:$4 sm:$0xff]   ;;  %v640_v10 = vld [vmem:[%s736_s16 + $0x24] ss:$8 sps:$4 sm:$0xff]   ;;  %v642_v11 = vld [vmem:[%s736_s16 + $0x20] ss:$8 sps:$4 sm:$0xff]  }
  0x13   : > { %v643_v12 = vld [vmem:[%s736_s16 + $0x14] ss:$8 sps:$4 sm:$0xff]   ;;  %v563_v13 = vld.sshfl [vmem:[%s182_s20] sm:$0x33 pattern:$0x76325410] }
  0x14   : > { %v244_v14 = vcombine.high %v563_v13, %v563_v13  ;;  %v645_v15 = vld [vmem:[%s736_s16 + $0x10] ss:$8 sps:$4 sm:$0xff]   ;;  %v646_v16 = vld [vmem:[%s736_s16 + $0x4] ss:$8 sps:$4 sm:$0xff]   ;;  %v648_v17 = vld [vmem:[%s736_s16] ss:$8 sps:$4 sm:$0xff]  }
  0x15   : > { %410 = vmatpush1.bf16.msra.mxu0 %v630_v3  ;;  %v649_v18 = vld [vmem:[%s736_s16 + $0xf4] ss:$8 sps:$4 sm:$0xff]   ;;  %v651_v19 = vld [vmem:[%s736_s16 + $0xf0] ss:$8 sps:$4 sm:$0xff]   ;;  %v652_v20 = vld [vmem:[%s736_s16 + $0xe4] ss:$8 sps:$4 sm:$0xff]  }
  0x16   : > { %411 = vmatprep.subr.bf16.mxu0 %v631_v4  ;;  %439 = vmatprep.mubr.bf16.mxu0 %v244_v14  ;;  %v654_v21 = vld [vmem:[%s736_s16 + $0xe0] ss:$8 sps:$4 sm:$0xff]   ;;  %v655_v22 = vld [vmem:[%s736_s16 + $0xd4] ss:$8 sps:$4 sm:$0xff]   ;;  %v657_v23 = vld [vmem:[%s736_s16 + $0xd0] ss:$8 sps:$4 sm:$0xff]  }
  0x17   : > { %v658_v24 = vld [vmem:[%s736_s16 + $0xc4] ss:$8 sps:$4 sm:$0xff]   ;;  %v660_v25 = vld [vmem:[%s736_s16 + $0xc0] ss:$8 sps:$4 sm:$0xff]   ;;  %v661_v26 = vld [vmem:[%s736_s16 + $0xb4] ss:$8 sps:$4 sm:$0xff]  }
  0x18   : > { %v663_v27 = vld [vmem:[%s736_s16 + $0xb0] ss:$8 sps:$4 sm:$0xff]   ;;  %v664_v28 = vld [vmem:[%s736_s16 + $0xa4] ss:$8 sps:$4 sm:$0xff]   ;;  %v666_v29 = vld [vmem:[%s736_s16 + $0xa0] ss:$8 sps:$4 sm:$0xff]  }
  0x19   : > { %412 = vmatpush1.bf16.msra.mxu0 %v633_v5  ;;  %v667_v30 = vld [vmem:[%s736_s16 + $0x94] ss:$8 sps:$4 sm:$0xff]   ;;  %v669_v31 = vld [vmem:[%s736_s16 + $0x90] ss:$8 sps:$4 sm:$0xff]   ;;  %v670_v32 = vld [vmem:[%s736_s16 + $0x84] ss:$8 sps:$4 sm:$0xff]  }
  0x1a   : > { %413 = vmatprep.subr.bf16.mxu0 %v634_v6  ;;  %v672_v33 = vld [vmem:[%s736_s16 + $0x80] ss:$8 sps:$4 sm:$0xff]   ;;  %s600_s21 = sshll.u32 %s795_s9, 3 }
  0x1b   : > { %s201_s24 = scalar_lea.vmem %s789_s2, %s600_s21 }
  0x1d   : > { %414 = vmatpush1.bf16.msra.mxu0 %v636_v7 }
  0x1e   : > { %415 = vmatprep.subr.bf16.mxu0 %v637_v8 }
  0x21   : > { %416 = vmatpush1.bf16.msra.mxu0 %v639_v9 }
  0x22   : > { %417 = vmatprep.subr.bf16.mxu0 %v640_v10 }
  0x25   : > { %418 = vmatpush1.bf16.msra.mxu0 %v642_v11 }
  0x26   : > { %419 = vmatprep.subr.bf16.mxu0 %v643_v12 }
  0x29   : > { %420 = vmatpush1.bf16.msra.mxu0 %v645_v15 }
  0x2a   : > { %421 = vmatprep.subr.bf16.mxu0 %v646_v16 }
  0x2d   : > { %422 = vmatpush1.bf16.msra.mxu0 %v648_v17 }
  0x2e   : > { %423 = vmatprep.subr.bf16.mxu0 %v649_v18 }
  0x31   : > { %424 = vmatpush2.bf16.msra.mxu0 %v651_v19 }
  0x32   : > { %425 = vmatprep.subr.bf16.mxu0 %v652_v20 }
  0x35   : > { %426 = vmatpush2.bf16.msra.mxu0 %v654_v21 }
  0x36   : > { %427 = vmatprep.subr.bf16.mxu0 %v655_v22 }
  0x39   : > { %428 = vmatpush2.bf16.msra.mxu0 %v657_v23 }
  0x3a   : > { %429 = vmatprep.subr.bf16.mxu0 %v658_v24 }
  0x3d   : > { %430 = vmatpush2.bf16.msra.mxu0 %v660_v25 }
  0x3e   : > { %431 = vmatprep.subr.bf16.mxu0 %v661_v26 }
  0x41   : > { %432 = vmatpush2.bf16.msra.mxu0 %v663_v27 }
  0x42   : > { %433 = vmatprep.subr.bf16.mxu0 %v664_v28 }
  0x45   : > { %434 = vmatpush2.bf16.msra.mxu0 %v666_v29 }
  0x46   : > { %435 = vmatprep.subr.bf16.mxu0 %v667_v30 }
  0x49   : > { %436 = vmatpush2.bf16.msra.mxu0 %v669_v31 }
  0x4a   : > { %437 = vmatprep.subr.bf16.mxu0 %v670_v32 }
  0x4d   : > { %438 = vmatpush2.bf16.msra.mxu0 %v672_v33 }
  0x50   : > { %440 = vmatmul.mubr.bf16.vlgmr.msra.gmra.mxu0 %v563_v13 }
 0x110   : > { %v441_v34 = vpop.f32.mrf.mxu0 }
 0x112   : > { %v443_v35 = vpop.f32.mrf.mxu0 }
 0x113   : > { %v450_v36 = vcombine.low %v441_v34, %v443_v35 }
 0x114   : > { %v445_v37 = vpop.f32.mrf.mxu0 }
 0x115   : > { %452 = vst [vmem:[%s201_s24] sm:$0x77] %v450_v36 }
 0x116   : > { %v446_v38 = vpop.f32.mrf.mxu0 }
 0x117 PF: > { %s12_s11 = sadd.s32 1, %s695_s11   ;;  %s790_s9 = smov %s691_s10 }
 0x118   : > { %p9_p5 = scmp.ge.s32.totalorder %s12_s11, 4   ;;  %s791_s10 = smov %s793_s12 }
 0x11a   :  { %11 = sbr.rel (!%p9_p5) target bundleno = 2 (0x2), region = 61 }

</bundles_post_ra>
